<compile_context>
chip_gen: v7x
topology: tpu7x:2x2x1
jax: 0.10.0
libtpu: 0.0.40
codegen_flags: <defaults>
</compile_context>

<pallas_src>
import functools

import jax
import jax.numpy as jnp
from jax.experimental import pallas as pl
from jax.experimental.pallas import tpu as pltpu

_MIB = 1024 * 1024


def _vmem_budget_bytes():
    """~80% of the physical per-core VMEM (headroom for Mosaic scratch)."""
    try:
        phys = int(pltpu.get_tpu_info().vmem_capacity_bytes)
    except Exception:
        phys = 64 * _MIB  # conservative fallback: v7x per-TensorCore size
    return int(phys * 0.8)


# ---------------------------------------------------------------------------
# Single-pass fused kernel: pool + excitation MLP + rescale in one HBM pass.
# ---------------------------------------------------------------------------
def _se_fused_kernel(x_ref, w1_ref, b1_ref, w2_ref, b2_ref, o_ref, *, inv_hw):
    # x_ref / o_ref: (Bt, C, HW) block.  w1: (C, Cr)  b1: (1, Cr)
    # w2: (Cr, C)  b2: (1, C).  Weights use constant index_maps -> resident.
    x = x_ref[...]                                             # input dtype

    # Squeeze: global average pool, accumulated in f32.  The block's logical
    # last-dim extent is exactly HW, so Mosaic masks any physical tail lanes.
    pooled = jnp.sum(x, axis=-1, dtype=jnp.float32) * inv_hw   # (Bt, C)

    # Excitation: FC -> ReLU -> FC -> sigmoid (tiny; MXU underuse is
    # irrelevant, this kernel is HBM-bandwidth bound).
    h = jnp.dot(pooled, w1_ref[...], preferred_element_type=jnp.float32) + b1_ref[...]
    h = jnp.maximum(h, 0.0)                                    # (Bt, Cr)
    z = jnp.dot(h, w2_ref[...], preferred_element_type=jnp.float32) + b2_ref[...]
    scale = jax.nn.sigmoid(z)                                  # (Bt, C) f32

    # Rescale in the input dtype (keeps packed bf16 VALU throughput on
    # v6e/v7x; gate rounding to bf16 is within normal tolerance).
    o_ref[...] = x * scale.astype(x.dtype)[:, :, None]


# ---------------------------------------------------------------------------
# Two-pass fallback: tiled pool kernel, tiny MLP in XLA, tiled rescale kernel.
# Used only when a fused (1, C, HW) slab does not fit the VMEM budget
# (1.5x HBM traffic since x is read twice).
# ---------------------------------------------------------------------------
def _pool_kernel(x_ref, p_ref, *, inv_hw):
    # x_ref: (1, TC, HW) -> p_ref: (1, TC, 1) f32.  Each block reduces its
    # full HW extent, so no cross-step accumulator / pl.when is needed.
    p_ref[...] = (jnp.sum(x_ref[...], axis=-1, dtype=jnp.float32) * inv_hw)[..., None]


def _rescale_kernel(x_ref, s_ref, o_ref):
    # x_ref / o_ref: (1, TC, HW); s_ref: (1, TC, 1) f32
    x = x_ref[...]
    o_ref[...] = x * s_ref[...].astype(x.dtype)


def _pick_c_tile(C, HW, itemsize, budget):
    """Largest multiple-of-8 divisor of C whose 4 pipelined blocks fit ~budget/2."""
    candidates = [tc for tc in range(8, C + 1, 8) if C % tc == 0]
    if not candidates:
        return C  # C < 8 or not a multiple of 8 (edge case): use full C
    fitting = [tc for tc in candidates if 4 * tc * HW * itemsize <= budget // 2]
    return max(fitting) if fitting else min(candidates)


def _se_two_pass(x_flat, w1_t, b1_2d, w2_t, b2_2d, H, W, budget, donate_x):
    B, C, HW = x_flat.shape
    itemsize = x_flat.dtype.itemsize
    TC = _pick_c_tile(C, HW, itemsize, budget)
    grid = (B, C // TC)
    vmem_limit = int(min(budget, max(8 * TC * HW * itemsize, 32 * _MIB)))
    cparams = pltpu.CompilerParams(
        dimension_semantics=("parallel", "parallel"),
        vmem_limit_bytes=vmem_limit,
    )

    # Pass 1: tiled global average pool.
    pooled = pl.pallas_call(
        functools.partial(_pool_kernel, inv_hw=1.0 / float(HW)),
        out_shape=jax.ShapeDtypeStruct((B, C, 1), jnp.float32),
        grid=grid,
        in_specs=[pl.BlockSpec((1, TC, HW), lambda b, c: (b, c, 0))],
        out_specs=pl.BlockSpec((1, TC, 1), lambda b, c: (b, c, 0)),
        compiler_params=cparams,
        cost_estimate=pl.CostEstimate(
            flops=B * C * HW, transcendentals=0,
            bytes_accessed=B * C * HW * itemsize + B * C * 4),
    )(x_flat)

    # Tiny excitation MLP on (B, C): leave to XLA (negligible vs HBM passes).
    y = pooled[..., 0]                                               # (B, C) f32
    h = jnp.maximum(jnp.dot(y, w1_t.astype(jnp.float32)) + b1_2d.astype(jnp.float32), 0.0)
    scale = jax.nn.sigmoid(jnp.dot(h, w2_t.astype(jnp.float32)) + b2_2d.astype(jnp.float32))
    scale3 = scale[..., None]                                        # (B, C, 1) f32

    # Pass 2: elementwise rescale.
    out_flat = pl.pallas_call(
        _rescale_kernel,
        out_shape=jax.ShapeDtypeStruct((B, C, HW), x_flat.dtype),
        grid=grid,
        in_specs=[pl.BlockSpec((1, TC, HW), lambda b, c: (b, c, 0)),
                  pl.BlockSpec((1, TC, 1), lambda b, c: (b, c, 0))],
        out_specs=pl.BlockSpec((1, TC, HW), lambda b, c: (b, c, 0)),
        compiler_params=cparams,
        cost_estimate=pl.CostEstimate(
            flops=B * C * HW, transcendentals=0,
            bytes_accessed=2 * B * C * HW * itemsize),
        input_output_aliases=({0: 0} if donate_x else {}),
    )(x_flat, scale3)
    return out_flat.reshape(B, C, H, W)


# ---------------------------------------------------------------------------
# Public wrapper
# ---------------------------------------------------------------------------
def se_block(x, w1, b1, w2, b2, *, donate_x=False, force_two_pass=False):
    """SE block forward.

    x: (B, C, H, W) NCHW.  PyTorch nn.Linear layout: w1 (Cr, C), b1 (Cr,),
    w2 (C, Cr), b2 (C,).  Set donate_x=True only if the caller donates x
    (otherwise XLA inserts a defensive copy for the alias).
    """
    B, C, H, W = x.shape
    HW = H * W
    Cr = w1.shape[0]
    itemsize = x.dtype.itemsize

    # No padding / slicing: the block's last two dims equal the full array
    # dims, so the (8,128) divisibility rule does not apply; the tail vector
    # store is simply masked in-kernel.
    x_flat = x.reshape(B, C, HW)

    # Pre-transpose Linear weights (out,in) -> (in,out); biases as 2D rows.
    w1_t = jnp.transpose(w1)        # (C, Cr)
    w2_t = jnp.transpose(w2)        # (Cr, C)
    b1_2d = b1.reshape(1, Cr)
    b2_2d = b2.reshape(1, C)

    budget = _vmem_budget_bytes()
    block_bytes_b1 = C * HW * itemsize          # one (1, C, HW) block
    # Weights/biases are tiny but double-buffered by default: count them x2.
    weights_bytes = 2 * ((w1_t.size + w2_t.size) * w1_t.dtype.itemsize
                         + (b1_2d.size + b2_2d.size) * b1_2d.dtype.itemsize)

    # Gate: if even a single-batch fused slab (2 in + 2 out buffers) would
    # blow ~half the scoped VMEM, use the two-pass structure instead.
    if force_two_pass or 4 * block_bytes_b1 + weights_bytes > budget // 2:
        return _se_two_pass(x_flat, w1_t, b1_2d, w2_t, b2_2d, H, W, budget, donate_x)

    # Batch tile: biggest that fits ~half the budget, but keep >=2 grid steps
    # so the DMA pipeline has overlap and v7x megacore has something to shard.
    bt_budget = max(1, (budget // 2 - weights_bytes) // (4 * block_bytes_b1))
    bt_pipeline = max(1, B // 2)
    Bt = max(1, min(B, bt_budget, bt_pipeline))
    while B % Bt:
        Bt -= 1
    grid = (B // Bt,)

    vmem_needed = 4 * Bt * block_bytes_b1 + weights_bytes + _MIB
    vmem_limit = int(min(budget, max(2 * vmem_needed, 32 * _MIB)))

    cost = pl.CostEstimate(
        flops=2 * B * C * HW + 4 * B * C * Cr,      # pool + rescale + two tiny FCs
        transcendentals=B * C,                      # sigmoid
        bytes_accessed=2 * B * C * HW * itemsize + weights_bytes // 2,
    )

    # TODO(synk): verify in an xprof trace that both v7x TensorCores are active
    # with "parallel" on the batch-tile axis; if not, switch to pltpu.CORE_PARALLEL.
    out_flat = pl.pallas_call(
        functools.partial(_se_fused_kernel, inv_hw=1.0 / float(HW)),
        out_shape=jax.ShapeDtypeStruct((B, C, HW), x.dtype),
        grid=grid,
        in_specs=[
            pl.BlockSpec((Bt, C, HW), lambda b: (b, 0, 0)),   # x: one batch tile / step
            pl.BlockSpec((C, Cr), lambda b: (0, 0)),          # weights stay resident
            pl.BlockSpec((1, Cr), lambda b: (0, 0)),
            pl.BlockSpec((Cr, C), lambda b: (0, 0)),
            pl.BlockSpec((1, C), lambda b: (0, 0)),
        ],
        out_specs=pl.BlockSpec((Bt, C, HW), lambda b: (b, 0, 0)),
        compiler_params=pltpu.CompilerParams(
            dimension_semantics=("parallel",),     # megacore sharding on v7x
            vmem_limit_bytes=vmem_limit,
        ),
        cost_estimate=cost,
        input_output_aliases=({0: 0} if donate_x else {}),
    )(x_flat, w1_t, b1_2d, w2_t, b2_2d)

    return out_flat.reshape(B, C, H, W)


def reference(x, w1, b1, w2, b2):
    """Pure-JAX reference matching the PyTorch forward."""
    y = jnp.mean(x, axis=(2, 3))                       # (B, C)
    y = jnp.maximum(y @ w1.T + b1, 0.0)                # (B, Cr)
    y = jax.nn.sigmoid(y @ w2.T + b2)                  # (B, C)
    return x * y[:, :, None, None]


if __name__ == "__main__":
    B, C, H, W = 2, 4, 16, 16
    reduction_ratio = 4
    Cr = max(1, C // reduction_ratio)

    key = jax.random.PRNGKey(0)
    kx, k1, k2, k3, k4 = jax.random.split(key, 5)

    x = jax.random.normal(kx, (B, C, H, W), dtype=jnp.float32)
    # PyTorch Linear shapes: weight (out, in), bias (out,).
    w1 = jax.random.normal(k1, (Cr, C), dtype=jnp.float32) * 0.5
    b1 = jax.random.normal(k2, (Cr,), dtype=jnp.float32) * 0.1
    w2 = jax.random.normal(k3, (C, Cr), dtype=jnp.float32) * 0.5
    b2 = jax.random.normal(k4, (C,), dtype=jnp.float32) * 0.1

    ref = reference(x, w1, b1, w2, b2)

    # Main fused single-pass path.
    out = jax.block_until_ready(se_block(x, w1, b1, w2, b2))
    assert out.shape == (B, C, H, W)
    assert jnp.allclose(out, ref, atol=1e-5, rtol=1e-5), "fused path mismatch"

    # Also exercise the two-pass fallback used for slabs too big for VMEM.
    out2 = jax.block_until_ready(se_block(x, w1, b1, w2, b2, force_two_pass=True))
    assert jnp.allclose(out2, ref, atol=1e-5, rtol=1e-5), "two-pass path mismatch"

    print("KERNEL_OK")
</pallas_src>

<mosaic_0001>
module attributes {stable_mosaic.version = 11 : i64} {
  func.func @_se_fused_kernel(%arg0: i32, %arg1: memref<1x4x256xf32, #tpu.memory_space<vmem>>, %arg2: memref<4x1xf32, #tpu.memory_space<vmem>>, %arg3: memref<1x1xf32, #tpu.memory_space<vmem>>, %arg4: memref<1x4xf32, #tpu.memory_space<vmem>>, %arg5: memref<1x4xf32, #tpu.memory_space<vmem>>, %arg6: memref<1x4x256xf32, #tpu.memory_space<vmem>>) attributes {dimension_semantics = [#tpu.dimension_semantics<parallel>], iteration_bounds = array<i64: 2>, scalar_prefetch = 0 : i64, scratch_operands = 0 : i64, tpu.core_type = #tpu.core_type<tc>, window_params = [{transform_indices = @transform_0, window_bounds = array<i64: 1, 4, 256>}, {pipeline_mode = #tpu.pipeline_mode<synchronous>, transform_indices = @transform_1, window_bounds = array<i64: 4, 1>}, {pipeline_mode = #tpu.pipeline_mode<synchronous>, transform_indices = @transform_2, window_bounds = array<i64: 1, 1>}, {pipeline_mode = #tpu.pipeline_mode<synchronous>, transform_indices = @transform_3, window_bounds = array<i64: 1, 4>}, {pipeline_mode = #tpu.pipeline_mode<synchronous>, transform_indices = @transform_4, window_bounds = array<i64: 1, 4>}, {transform_indices = @transform_5, window_bounds = array<i64: 1, 4, 256>}]} {
    %c0 = arith.constant 0 : index
    %c0_0 = arith.constant 0 : index
    %c0_1 = arith.constant 0 : index
    %0 = vector.load %arg1[%c0, %c0_0, %c0_1] : memref<1x4x256xf32, #tpu.memory_space<vmem>>, vector<1x4x256xf32>
    %cst = arith.constant dense<0.000000e+00> : vector<1x4xf32>
    %1 = vector.multi_reduction <add>, %0, %cst [2] : vector<1x4x256xf32> to vector<1x4xf32>
    %cst_2 = arith.constant 3.906250e-03 : f32
    %2 = vector.broadcast %cst_2 : f32 to vector<1x4xf32>
    %3 = arith.mulf %1, %2 : vector<1x4xf32>
    %c0_3 = arith.constant 0 : index
    %c0_4 = arith.constant 0 : index
    %4 = vector.load %arg2[%c0_3, %c0_4] : memref<4x1xf32, #tpu.memory_space<vmem>>, vector<4x1xf32>
    %cst_5 = arith.constant dense<0.000000e+00> : vector<1x1xf32>
    %5 = tpu.matmul %3, %4, %cst_5 {dimension_numbers = #tpu.dot_dimension_numbers<[1], [0], [0], [1], [0, 0, 1, 1], [], []>} : vector<1x4xf32>, vector<4x1xf32>, vector<1x1xf32> -> vector<1x1xf32>
    %c0_6 = arith.constant 0 : index
    %c0_7 = arith.constant 0 : index
    %6 = vector.load %arg3[%c0_6, %c0_7] : memref<1x1xf32, #tpu.memory_space<vmem>>, vector<1x1xf32>
    %7 = arith.addf %5, %6 : vector<1x1xf32>
    %cst_8 = arith.constant 0.000000e+00 : f32
    %8 = vector.broadcast %cst_8 : f32 to vector<1x1xf32>
    %9 = arith.maximumf %7, %8 : vector<1x1xf32>
    %c0_9 = arith.constant 0 : index
    %c0_10 = arith.constant 0 : index
    %10 = vector.load %arg4[%c0_9, %c0_10] : memref<1x4xf32, #tpu.memory_space<vmem>>, vector<1x4xf32>
    %cst_11 = arith.constant dense<0.000000e+00> : vector<1x4xf32>
    %11 = tpu.matmul %9, %10, %cst_11 {dimension_numbers = #tpu.dot_dimension_numbers<[1], [0], [0], [1], [0, 0, 1, 1], [], []>} : vector<1x1xf32>, vector<1x4xf32>, vector<1x4xf32> -> vector<1x4xf32>
    %c0_12 = arith.constant 0 : index
    %c0_13 = arith.constant 0 : index
    %12 = vector.load %arg5[%c0_12, %c0_13] : memref<1x4xf32, #tpu.memory_space<vmem>>, vector<1x4xf32>
    %13 = arith.addf %11, %12 : vector<1x4xf32>
    %14 = arith.negf %13 : vector<1x4xf32>
    %15 = math.exp %14 : vector<1x4xf32>
    %cst_14 = arith.constant 1.000000e+00 : f32
    %16 = vector.broadcast %cst_14 : f32 to vector<1x4xf32>
    %17 = arith.addf %16, %15 : vector<1x4xf32>
    %18 = arith.divf %16, %17 : vector<1x4xf32>
    %19 = vector.shape_cast %18 : vector<1x4xf32> to vector<1x4x1xf32>
    %20 = vector.broadcast %19 : vector<1x4x1xf32> to vector<1x4x256xf32>
    %21 = arith.mulf %0, %20 : vector<1x4x256xf32>
    %c0_15 = arith.constant 0 : index
    %c0_16 = arith.constant 0 : index
    %c0_17 = arith.constant 0 : index
    %22 = vector.load %arg6[%c0_15, %c0_16, %c0_17] : memref<1x4x256xf32, #tpu.memory_space<vmem>>, vector<1x4x256xf32>
    tpu.vector_store %arg6[%c0_15, %c0_16, %c0_17], %21 {strides = array<i32>} : memref<1x4x256xf32, #tpu.memory_space<vmem>>, vector<1x4x256xf32>,
    return
  }
  func.func @transform_0(%arg0: i32) -> (i32, i32, i32) {
    %c0_i32 = arith.constant 0 : i32
    %c0_i32_0 = arith.constant 0 : i32
    %c0_i32_1 = arith.constant 0 : i32
    return %arg0, %c0_i32, %c0_i32_0 : i32, i32, i32
  }
  func.func @transform_1(%arg0: i32) -> (i32, i32) {
    %c0_i32 = arith.constant 0 : i32
    %c0_i32_0 = arith.constant 0 : i32
    %c0_i32_1 = arith.constant 0 : i32
    return %c0_i32, %c0_i32_0 : i32, i32
  }
  func.func @transform_2(%arg0: i32) -> (i32, i32) {
    %c0_i32 = arith.constant 0 : i32
    %c0_i32_0 = arith.constant 0 : i32
    %c0_i32_1 = arith.constant 0 : i32
    return %c0_i32, %c0_i32_0 : i32, i32
  }
  func.func @transform_3(%arg0: i32) -> (i32, i32) {
    %c0_i32 = arith.constant 0 : i32
    %c0_i32_0 = arith.constant 0 : i32
    %c0_i32_1 = arith.constant 0 : i32
    return %c0_i32, %c0_i32_0 : i32, i32
  }
  func.func @transform_4(%arg0: i32) -> (i32, i32) {
    %c0_i32 = arith.constant 0 : i32
    %c0_i32_0 = arith.constant 0 : i32
    %c0_i32_1 = arith.constant 0 : i32
    return %c0_i32, %c0_i32_0 : i32, i32
  }
  func.func @transform_5(%arg0: i32) -> (i32, i32, i32) {
    %c0_i32 = arith.constant 0 : i32
    %c0_i32_0 = arith.constant 0 : i32
    %c0_i32_1 = arith.constant 0 : i32
    return %arg0, %c0_i32, %c0_i32_0 : i32, i32, i32
  }
}

</mosaic_0001>

<bundles_post_ra>
// kernel: tpu_custom_call.1
= control target key start
LH: loop header
LB: loop body
LE: loop exit
PB: predicated region body
PF: predicated region fallthrough
CT: control target
= control target key end

     0   :  { %s928_s0 = inlined_call_operand.hbm [shape: f32[2,4,256], index: 0, kind: input, shape index: {}]   ;;  %s929_s1 = inlined_call_operand.vmem [shape: f32[4,1], index: 1, kind: input, shape index: {}]   ;;  %s930_s2 = inlined_call_operand.<no memory space> [shape: f32[1,1], index: 2, kind: input, shape index: {}]   ;;  %s931_s3 = inlined_call_operand.vmem [shape: f32[1,4], index: 3, kind: input, shape index: {}]   ;;  %s932_s4 = inlined_call_operand.vmem [shape: f32[1,4], index: 4, kind: input, shape index: {}]   ;;  %s933_s5 = inlined_call_operand.hbm [shape: f32[2,4,256], index: 5, kind: output, shape index: {}]  }
   0x1   :  { %v10_v0 = vstv %s930_s2 }
   0x2   :  { %11 = vst [vmem:[#allocation2] sm:$0x1] %v10_v0 }
   0x3   :  { %12 = vsyncpa [#allocation4], 0 }
   0x4   :  { %14 = vsyncpa [#allocation4 + $0x1], 0 }
   0x5   :  { %15 = vsyncpa [#allocation5], 0 }
   0x6   :  { %17 = vsyncpa [#allocation5 + $0x1], 0  ;;  %s754_s20 = smov 0   ;;  %s756_s21 = smov 0  }
   0x7   :  { %s758_s22 = smov 0   ;;  %s760_s23 = smov 0  }
   0x8 LB: > { %s775_s2 = sadd.s32 4294967295, %s714_s23   ;;  %s529_s24 = sadd.s32 4294967294, %s714_s23   ;;  %s714_s23 = sphi %s760_s23, %s948_s23   ;;  %s710_s22 = sphi %s758_s22, %s947_s22   ;;  %s706_s21 = sphi %s756_s21, %s946_s21   ;;  %s702_s20 = sphi %s754_s20, %s945_s20  }
   0x9   : > { %s779_s25 = sadd.s32 1, %s714_s23   ;;  %s30_s26 = sadd.s32 1, %s710_s22 }
   0xa   : > { %s27_s27 = ssub.s32 %s714_s23, %s779_s25  ;;  %p37_p0 = scmp.ne.s32.totalorder %s710_s22, %s706_s21 }
   0xb   : > { %p28_p1 = scmp.eq.s32.totalorder %s27_s27, 0  ;;  %p38_p2 = scmp.eq.s32.totalorder %s714_s23, 0 }
   0xc   : > { %p43_p3 = scmp.ne.s32.totalorder %s706_s21, %s702_s20  ;;  %p44_p4 = scmp.eq.s32.totalorder %s775_s2, 0 }
   0xd   : > { %s791_s28 = scalar_select %p28_p1, %s710_s22, %s30_s26  }
   0xe   : > { %p793_p5 = por %p38_p2, %p37_p0  ;;  %p797_p6 = por %p44_p4, %p43_p3 }
   0xf   : > { %p151_p7 = scmp.eq.s32.totalorder %s775_s2, 1  ;;  %p157_p8 = scmp.eq.s32.totalorder %s529_s24, 1 }
  0x10   : > { %p576_p10 = scmp.lt.s32.totalorder %s714_s23, 2  ;;  %s189_s8 = sand.u32 1, %s710_s22  }
  0x11   : > { %p804_p11 = por %p151_p7, %p37_p0  ;;  %p808_p12 = por %p157_p8, %p43_p3 }
  0x12   : > { %s548_s9 = sshll.u32 %s714_s23, 7  ;;  %s532_s10 = sshll.u32 %s189_s8, 3 }
  0x13   : > { %s937_s6 = scalar_select %p804_p11, 1, 0 }
  0x14   : > { %s938_s7 = scalar_select %p808_p12, 1, 0 }
  0x15   : > { %s817_s13 = scalar_lea.hbm %s928_s0, %s548_s9  ;;  %s193_s14 = scalar_lea.vmem [#allocation3], %s532_s10 }
  0x16   : > { %s201_s15 = sshll.u32 %s193_s14, 4  ;;  %p821_p13 = pnand %p576_p10, %p793_p5  ;;  %s825_s15 = int_to_ptr.vmem [resolvable:$true] %s201_s15 }
  0x17   : > { %s190_s17 = scalar_lea.sflag [#allocation4], %s189_s8  ;;  %s618_s18 = scalar_lea.hbm %s817_s13, 128 }
  0x18   : > { %p619_p2 = scmp.ne.s32.totalorder %s817_s13, %s618_s18  ;;  %p620_p3 = pneg %p821_p13 }
  0x19   : > { %s623_s26 = scalar_lea.hbm %s928_s0, 256  ;;  %p624_p5 = scmp.lt.u32.totalorder %s817_s13, %s928_s0 }
  0x1a   : > { %p621_p4 = pnand %p620_p3, %p619_p2  ;;  %p625_p8 = scmp.lt.u32.totalorder %s623_s26, %s618_s18 }
  0x1b   : > { %p627_p9 = scmp.lt.u32.totalorder %s618_s18, %s817_s13 }
  0x1c   : > { %p622_p7 = pneg %p621_p4  ;;  %p626_p10 = por %p625_p8, %p624_p5 }
  0x1e   : > { %p628_p0 = por %p627_p9, %p626_p10 }
  0x20   : > { %p629_p1 = pnand %p628_p0, %p622_p7 }
  0x22   : > { %632 = shalt.err (!%p629_p1)
}
  0x23   : > { %s633_s8 = scalar_lea.vmem %s825_s15, 128  ;;  %s716_s9 = smov [#allocation3]  }
  0x24   : > { %p634_p2 = scmp.ne.s32.totalorder %s825_s15, %s633_s8  ;;  %s638_s10 = sshll.u32 %s716_s9, 4  ;;  %s639_s10 = int_to_ptr.vmem [resolvable:$false] %s638_s10 }
  0x25   : > { %s640_s11 = scalar_lea.vmem %s639_s10, 256  ;;  %p641_p11 = scmp.lt.s32.totalorder %s825_s15, %s639_s10 }
  0x26   : > { %p636_p4 = pnand %p634_p2, %p620_p3  ;;  %p642_p5 = scmp.lt.s32.totalorder %s640_s11, %s633_s8 }
  0x28   : > { %p637_p12 = pneg %p636_p4  ;;  %p643_p8 = por %p642_p5, %p641_p11 }
  0x2a   : > { %p644_p9 = pnand %p643_p8, %p637_p12 }
  0x2c   : > { %647 = shalt.err (!%p644_p9)
}
  0x2d   : > { %571 = dma.hbm_to_vmem [thread:$0]  (!%p821_p13), %s817_s13, 128, %s825_s15, %s190_s17  }
  0x2e   : > { %p940_p0 = scmp.lt.s32.totalorder %s714_s23, 3  ;;  %p941_p1 = scmp.ge.s32.totalorder %s714_s23, 1 }
  0x30   : > { %p207_p3 = pnand %p941_p1, %p940_p0 }
  0x31   : > { %s859_s12 = sand.u32 (!%p207_p3), 1, %s706_s21  }
  0x32   : > { %210 = sbr.rel (%p207_p3) target bundleno = 801 (0x321), region = 40  ;;  %s536_s14 = sshll.u32 (!%p207_p3), %s859_s12, 3 }
  0x33   : > { %s213_s18 = scalar_lea.sflag (!%p207_p3), [#allocation4], %s859_s12  ;;  %s216_s16 = scalar_lea.vmem (!%p207_p3), [#allocation3], %s536_s14 }
  0x39   : > { %693 = dma.done.wait (%p797_p6), %s213_s18, 128  }
  0x3a   : > { %695 = vsyncadd (%p797_p6), %s213_s18, 4294967168  ;;  %vm247_vm0 = vcmask 1043456   ;;  %v243_v1 = vld [vmem:[%s216_s16] sm:$0xff]  ;;  %v717_v6 = vmov 0.0   ;;  %vm718_vm1 = vmmov 0   ;;  %v257_v8 = vlaneseq  ;;  %s549_s26 = sshll.u32 %s775_s2, 7 }
  0x3b   : > { %v245_v2 = vcombine.high %v243_v1, %v243_v1  ;;  %v248_v3 = vsel %vm247_vm0, %v243_v1, 0.0  ;;  %554 = vmatprep.subr.mxu0 %v717_v6  ;;  %v254_v7 = vld [vmem:[%s929_s1] sm:$0xf]  ;;  %559 = vmatprep.subr.mxu1 %v717_v6  ;;  %vm263_vm2 = vcmask 31744   ;;  %vm346_vm3 = vcmask 1040384   ;;  %s242_s27 = scalar_lea.vmem [#allocation6], %s536_s14  ;;  %s884_s10 = scalar_lea.hbm %s933_s5, %s549_s26 }
  0x3c   : > { %555 = vmatpush3.msk.msra.mxu0 %vm247_vm0, %v254_v7  ;;  %556 = vmatprep.mubr.msk.f32.mxu0 %vm718_vm1, %v717_v6  ;;  %v258_v9 = vand.u32 127, %v257_v8  ;;  %v260_v10 = vshrl.u32 %v257_v8, 7  ;;  %v340_v15 = vld [vmem:[%s931_s3] sm:$0x1]  ;;  %vm342_vm4 = vcmask 7168   ;;  %s459_s29 = sshll.u32 %s242_s27, 4  ;;  %s886_s29 = int_to_ptr.vmem [resolvable:$true] %s459_s29 }
  0x3d   : > { %v249_v4 = vsel %vm247_vm0, %v245_v2, 0.0  ;;  %561 = vmatprep.mubr.msk.f32.mxu1 %vm718_vm1, %v717_v6  ;;  %560 = vmatpush3.msk.msra.mxu1 %vm346_vm3, %v340_v15  ;;  %v255_v16 = vld [vmem:[#allocation2] sm:$0x1]  ;;  %v719_v31 = vmov 839922192   ;;  %s445_s11 = scalar_lea.sflag [#allocation5], %s859_s12 }
  0x3e   : > { %v250_v5 = vadd.f32 %v249_v4, %v248_v3  ;;  %v261_v11 = vsub.s32 %v258_v9, %v260_v10  ;;  %v341_v21 = vld [vmem:[%s932_s4] sm:$0x1]  ;;  %v428_v28 = vsub.s32 0, %v260_v10  ;;  %v435_v32 = vunpack.c.l.s4 %v719_v31  ;;  %s648_s18 = scalar_lea.vmem %s886_s29, 128  ;;  %p942_p11 = scmp.ne.s32.totalorder %s937_s6, 0 }
  0x3f   : > { %p649_p6 = scmp.ne.s32.totalorder %s886_s29, %s648_s18  ;;  %s720_s2 = smov [#allocation6]  }
  0x40   : > { %251 = vadd.xlane.f32.xlu0 %v250_v5  ;;  %v436_v33 = vunpack.c.0.s8 %v435_v32  ;;  %s652_s14 = sshll.u32 %s720_s2, 4  ;;  %s653_s14 = int_to_ptr.vmem [resolvable:$false] %s652_s14 }
  0x41   : > { %p650_p12 = pnand %p649_p6, %p942_p11  ;;  %s654_s16 = scalar_lea.vmem %s653_s14, 256 }
  0x42   : > { %v439_v34 = vsub.s32 %v436_v33, %v260_v10  ;;  %p655_p7 = scmp.lt.s32.totalorder %s886_s29, %s653_s14  ;;  %p656_p10 = scmp.lt.s32.totalorder %s654_s16, %s648_s18 }
  0x43   : > { %p651_p13 = pneg %p650_p12 }
  0x44   : > { %p657_p2 = por %p656_p10, %p655_p7 }
  0x46   : > { %p658_p4 = pnand %p657_p2, %p651_p13 }
  0xcd   : > { %v252_v12 = vpop.xlane.xlu0 %251 }
  0xce   : > { %v253_v13 = vmul.f32 0.00390625, %v252_v12 }
  0xd0   : > { %v262_v14 = vrot.slane %v253_v13, %v261_v11 }
  0xd2   : > { %557 = vmatmul.mubr.msk.f32.vlgmr.msra.gmra.mrb[0].mxu0 %vm263_vm2, %v262_v14 }
 0x1a5   : > { %v335_v17 = vpop.f32.mrb[0].mxu0 }
 0x1a6   : > { %v336_v18 = vadd.f32 %v335_v17, %v255_v16  ;;  %v558_v19 = vpop.f32.mrb[1].mxu0 }
 0x1a8   : > { %v339_v20 = vmax.f32 %v336_v18, 0.0 }
 0x1aa   : > { %562 = vmatmul.mubr.msk.f32.vlgmr.msra.gmra.mrb[0].mxu1 %vm342_vm4, %v339_v20 }
 0x27d   : > { %v416_v22 = vpop.f32.mrb[0].mxu1 }
 0x27e   : > { %v417_v23 = vadd.f32 %v416_v22, %v341_v21  ;;  %v563_v24 = vpop.f32.mrb[1].mxu1 }
 0x280   : > { %v542_v25 = vmul.f32 -1.442695, %v417_v23 }
 0x282   : > { %614 = vpow2.f32 %v542_v25 }
 0x28c   : > { %v615_v26 = vpop.eup %614 }
 0x28d   : > { %v423_v27 = vadd.f32 1.0, %v615_v26 }
 0x28f   : > { %616 = vrcp.f32 %v423_v27 }
 0x299   : > { %v617_v29 = vpop.eup %616 }
 0x29a   : > { %v429_v30 = vrot.slane %v617_v29, %v428_v28 }
 0x29c   : > { %431 = vbcast.lane.b32.xlu0 %v429_v30, 256 }
 0x30e   : > { %v432_v35 = vpop.permute.xlu0 %431 }
 0x30f   : > { %v440_v36 = vrot.slane %v432_v35, %v439_v34 }
 0x311   : > { %v442_v37 = vmul.f32 %v440_v36, %v243_v1 }
 0x313   : > { %443 = vst [vmem:[%s242_s27] sm:$0xff] %v442_v37 }
 0x314   : > { %661 = shalt.err (!%p658_p4)
}
 0x315   : > { %s662_s12 = scalar_lea.hbm %s884_s10, 128  ;;  %s666_s30 = scalar_lea.hbm %s933_s5, 256 }
 0x316   : > { %p663_p5 = scmp.ne.s32.totalorder %s884_s10, %s662_s12  ;;  %p667_p0 = scmp.lt.u32.totalorder %s884_s10, %s933_s5 }
 0x317   : > { %p668_p1 = scmp.lt.u32.totalorder %s666_s30, %s662_s12  ;;  %p670_p6 = scmp.lt.u32.totalorder %s662_s12, %s884_s10 }
 0x318   : > { %p664_p8 = pnand %p663_p5, %p942_p11 }
 0x319   : > { %p669_p3 = por %p668_p1, %p667_p0 }
 0x31a   : > { %p665_p9 = pneg %p664_p8 }
 0x31b   : > { %p671_p12 = por %p670_p6, %p669_p3 }
 0x31d   : > { %p672_p13 = pnand %p671_p12, %p665_p9 }
 0x31f   : > { %675 = shalt.err (!%p672_p13)
}
 0x320   : > { %566 = dma.vmem_to_hbm [thread:$0]  (%p942_p11), %s886_s29, 128, %s884_s10, %s445_s11  }
 0x321 PF: > { %s471_s24 = sand.u32 1, %s702_s20   ;;  %p943_p7 = scmp.ne.s32.totalorder %s938_s7, 0 }
 0x322   : > { %p944_p10 = scmp.ge.s32.totalorder %s714_s23, 2  ;;  %s472_s26 = scalar_lea.sflag [#allocation5], %s471_s24 }
 0x324   : > { %p573_p2 = pnand %p944_p10, %p943_p7 }
 0x326   : > { %697 = dma.done.wait (!%p573_p2), %s472_s26, 128  }
 0x327   : > { %699 = vsyncadd (!%p573_p2), %s472_s26, 4294967168  ;;  %p20_p4 = scmp.ge.s32.totalorder %s779_s25, 4   ;;  %s945_s20 = smov %s706_s21 }
 0x328   : > { %s946_s21 = smov %s710_s22  ;;  %s947_s22 = smov %s791_s28 }
 0x329   : > { %s948_s23 = smov %s779_s25  ;;  %22 = sbr.rel (!%p20_p4) target bundleno = 8 (0x8), region = 85 }
 0x330   :  { %477 = vsyncpa [#allocation4], 1 }
 0x331   :  { %479 = vsyncpa [#allocation4 + $0x1], 1 }
 0x332   :  { %480 = vsyncpa [#allocation5], 1 }
 0x333   :  { %482 = vsyncpa [#allocation5 + $0x1], 1 }

</bundles_post_ra>
